<compile_context>
chip_gen: v7x
topology: tpu7x:2x2x1
jax: 0.10.0
libtpu: 0.0.40
codegen_flags: <defaults>
</compile_context>

<pallas_src>
import functools
import math

import jax
import jax.numpy as jnp
from jax import lax
from jax.experimental import pallas as pl
from jax.experimental.pallas import tpu as pltpu


def _mha_kernel(x_ref, wqkv_ref, bqkv_ref, o_ref, *, n_heads, dh, df, scale):
    """One grid step handles one batch element.

    x_ref    : (1, N, df)    input tokens for this batch element (bf16)
    wqkv_ref : (df, 3*df)    fused [W_Q | W_K | W_V] weight (bf16, (in,out))
    bqkv_ref : (1, 3*df)     fused [b_Q | b_K | b_V] bias (fp32)
    o_ref    : (1, N, df)    output context C (fp32)
    """
    x = x_ref[0]  # (N, df) bf16

    # Fused Q/K/V projection: one MXU matmul, fp32 accumulation, fp32 bias.
    qkv = jnp.dot(x, wqkv_ref[...],
                  preferred_element_type=jnp.float32) + bqkv_ref[0]  # (N, 3df)

    # Hoist the 1/sqrt(dh) scaling onto Q (once, instead of per-head scores).
    q = (qkv[:, 0 * df:1 * df] * scale).astype(jnp.bfloat16)
    k = qkv[:, 1 * df:2 * df].astype(jnp.bfloat16)
    v = qkv[:, 2 * df:3 * df].astype(jnp.bfloat16)

    ctx = []
    for h in range(n_heads):                       # static, unrolled
        lo = h * dh
        qh = q[:, lo:lo + dh]                      # (N, dh)
        kh = k[:, lo:lo + dh]                      # (N, dh)
        vh = v[:, lo:lo + dh]                      # (N, dh)

        # scores S_h = Q_h K_h^T  (contract last dims directly; no transpose)
        s = lax.dot_general(qh, kh, (((1,), (1,)), ((), ())),
                            preferred_element_type=jnp.float32)      # (N, N)

        # numerically stable softmax; divide via EUP reciprocal (approx).
        s = s - jnp.max(s, axis=-1, keepdims=True)
        p = jnp.exp(s)
        a = p * pl.reciprocal(jnp.sum(p, axis=-1, keepdims=True), approx=True)

        # context for this head
        ctx.append(jnp.dot(a.astype(jnp.bfloat16), vh,
                           preferred_element_type=jnp.float32))      # (N, dh)

    # _compose: one lane-dense (N, df) store (instead of n_heads masked stores)
    o_ref[0] = jnp.concatenate(ctx, axis=-1).astype(o_ref.dtype)


def multihead_attention(x, wq, wk, wv, bq, bk, bv, *, n_heads):
    B, N, df = x.shape
    assert wq.shape == (df, df) and wk.shape == (df, df) and wv.shape == (df, df)
    dh = df // n_heads
    scale = 1.0 / math.sqrt(dh)

    # Fuse the three projections into a single weight / bias (wrapper-side).
    wqkv = jnp.concatenate([wq, wk, wv], axis=1).astype(jnp.bfloat16)  # (df, 3df)
    bqkv = jnp.concatenate([bq, bk, bv], axis=1)                       # (1, 3df)
    x_bf16 = x.astype(jnp.bfloat16)

    kernel = functools.partial(_mha_kernel, n_heads=n_heads, dh=dh, df=df,
                               scale=scale)

    return pl.pallas_call(
        kernel,
        out_shape=jax.ShapeDtypeStruct((B, N, df), x.dtype),
        grid=(B,),
        in_specs=[
            pl.BlockSpec((1, N, df), lambda b: (b, 0, 0)),     # x
            pl.BlockSpec((df, 3 * df), lambda b: (0, 0)),      # fused W_QKV
            pl.BlockSpec((1, 3 * df), lambda b: (0, 0)),       # fused b_QKV
        ],
        out_specs=pl.BlockSpec((1, N, df), lambda b: (b, 0, 0)),
        compiler_params=pltpu.CompilerParams(
            dimension_semantics=("parallel",)),   # keeps both v7x TCs busy
    )(x_bf16, wqkv, bqkv)


def _reference(x, wq, wk, wv, bq, bk, bv, n_heads):
    """Pure-JAX fp32 reference mirroring the PyTorch forward (eval mode)."""
    B, N, df = x.shape
    dh = df // n_heads

    def split(t):  # (B, N, df) -> (B, H, N, dh)
        return t.reshape(B, N, n_heads, dh).transpose(0, 2, 1, 3)

    Q = split(x @ wq + bq[0])
    K = split(x @ wk + bk[0])
    V = split(x @ wv + bv[0])
    S = jnp.einsum('bhnd,bhmd->bhnm', Q, K) / math.sqrt(dh)
    A = jax.nn.softmax(S, axis=-1)
    C = jnp.einsum('bhnm,bhmd->bhnd', A, V)
    return C.transpose(0, 2, 1, 3).reshape(B, N, df)


if __name__ == "__main__":
    # Config: df = dq = dk = dv = 32, n_heads = 4 (dh = 8), seq = 8, batch = 2.
    B, N, DF, H = 2, 8, 32, 4

    key = jax.random.PRNGKey(0)
    kx, kq, kk, kv, kbq, kbk, kbv = jax.random.split(key, 7)

    x = jax.random.normal(kx, (B, N, DF), dtype=jnp.float32)

    # Deterministic parameter init (Linear weights in (in, out) layout).
    bound = 1.0 / math.sqrt(DF)
    wq = jax.random.uniform(kq, (DF, DF), jnp.float32, -bound, bound)
    wk = jax.random.uniform(kk, (DF, DF), jnp.float32, -bound, bound)
    wv = jax.random.uniform(kv, (DF, DF), jnp.float32, -bound, bound)
    bq = jax.random.uniform(kbq, (1, DF), jnp.float32, -bound, bound)
    bk = jax.random.uniform(kbk, (1, DF), jnp.float32, -bound, bound)
    bv = jax.random.uniform(kbv, (1, DF), jnp.float32, -bound, bound)

    out = multihead_attention(x, wq, wk, wv, bq, bk, bv, n_heads=H)
    out = jax.block_until_ready(out)

    ref = _reference(x, wq, wk, wv, bq, bk, bv, H)
    assert out.shape == (B, N, DF)
    # Tolerance accounts for bf16 MXU operands + approx reciprocal in-kernel
    # vs the fp32 reference.
    assert jnp.allclose(out, ref, atol=5e-2, rtol=5e-2), "mismatch vs reference"

    print("KERNEL_OK")
</pallas_src>

<mosaic_0001>
module attributes {stable_mosaic.version = 11 : i64} {
  func.func @_mha_kernel(%arg0: i32, %arg1: memref<1x8x32xbf16, #tpu.memory_space<vmem>>, %arg2: memref<32x96xbf16, #tpu.memory_space<vmem>>, %arg3: memref<1x96xf32, #tpu.memory_space<vmem>>, %arg4: memref<1x8x32xf32, #tpu.memory_space<vmem>>) attributes {dimension_semantics = [#tpu.dimension_semantics<parallel>], iteration_bounds = array<i64: 2>, scalar_prefetch = 0 : i64, scratch_operands = 0 : i64, tpu.core_type = #tpu.core_type<tc>, window_params = [{transform_indices = @transform_0, window_bounds = array<i64: 1, 8, 32>}, {pipeline_mode = #tpu.pipeline_mode<synchronous>, transform_indices = @transform_1, window_bounds = array<i64: 32, 96>}, {pipeline_mode = #tpu.pipeline_mode<synchronous>, transform_indices = @transform_2, window_bounds = array<i64: 1, 96>}, {transform_indices = @transform_3, window_bounds = array<i64: 1, 8, 32>}]} {
    %c0 = arith.constant 0 : index
    %c0_0 = arith.constant 0 : index
    %c0_1 = arith.constant 0 : index
    %0 = vector.load %arg1[%c0, %c0_0, %c0_1] : memref<1x8x32xbf16, #tpu.memory_space<vmem>>, vector<1x8x32xbf16>
    %1 = vector.shape_cast %0 : vector<1x8x32xbf16> to vector<8x32xbf16>
    %c0_2 = arith.constant 0 : index
    %c0_3 = arith.constant 0 : index
    %2 = vector.load %arg2[%c0_2, %c0_3] : memref<32x96xbf16, #tpu.memory_space<vmem>>, vector<32x96xbf16>
    %cst = arith.constant dense<0.000000e+00> : vector<8x96xf32>
    %3 = tpu.matmul %1, %2, %cst {dimension_numbers = #tpu.dot_dimension_numbers<[1], [0], [0], [1], [0, 0, 1, 1], [], []>} : vector<8x32xbf16>, vector<32x96xbf16>, vector<8x96xf32> -> vector<8x96xf32>
    %c0_4 = arith.constant 0 : index
    %c0_5 = arith.constant 0 : index
    %4 = vector.load %arg3[%c0_4, %c0_5] : memref<1x96xf32, #tpu.memory_space<vmem>>, vector<1x96xf32>
    %5 = vector.shape_cast %4 : vector<1x96xf32> to vector<96xf32>
    %6 = vector.shape_cast %5 : vector<96xf32> to vector<1x96xf32>
    %7 = vector.broadcast %6 : vector<1x96xf32> to vector<8x96xf32>
    %8 = arith.addf %3, %7 : vector<8x96xf32>
    %9 = vector.extract_strided_slice %8 {offsets = [0, 0], sizes = [8, 32], strides = [1, 1]} : vector<8x96xf32> to vector<8x32xf32>
    %cst_6 = arith.constant 0.353553385 : f32
    %10 = vector.broadcast %cst_6 : f32 to vector<8x32xf32>
    %11 = arith.mulf %9, %10 : vector<8x32xf32>
    %12 = arith.truncf %11 : vector<8x32xf32> to vector<8x32xbf16>
    %13 = vector.extract_strided_slice %8 {offsets = [0, 32], sizes = [8, 32], strides = [1, 1]} : vector<8x96xf32> to vector<8x32xf32>
    %14 = arith.truncf %13 : vector<8x32xf32> to vector<8x32xbf16>
    %15 = vector.extract_strided_slice %8 {offsets = [0, 64], sizes = [8, 32], strides = [1, 1]} : vector<8x96xf32> to vector<8x32xf32>
    %16 = arith.truncf %15 : vector<8x32xf32> to vector<8x32xbf16>
    %17 = vector.extract_strided_slice %12 {offsets = [0, 0], sizes = [8, 8], strides = [1, 1]} : vector<8x32xbf16> to vector<8x8xbf16>
    %18 = vector.extract_strided_slice %14 {offsets = [0, 0], sizes = [8, 8], strides = [1, 1]} : vector<8x32xbf16> to vector<8x8xbf16>
    %19 = vector.extract_strided_slice %16 {offsets = [0, 0], sizes = [8, 8], strides = [1, 1]} : vector<8x32xbf16> to vector<8x8xbf16>
    %cst_7 = arith.constant dense<0.000000e+00> : vector<8x8xf32>
    %20 = tpu.matmul %17, %18, %cst_7 {dimension_numbers = #tpu.dot_dimension_numbers<[1], [1], [0], [0], [0, 0, 1, 0], [], []>} : vector<8x8xbf16>, vector<8x8xbf16>, vector<8x8xf32> -> vector<8x8xf32>
    %cst_8 = arith.constant dense<0xFF800000> : vector<8xf32>
    %21 = vector.multi_reduction <maximumf>, %20, %cst_8 [1] : vector<8x8xf32> to vector<8xf32>
    %22 = vector.shape_cast %21 : vector<8xf32> to vector<8x1xf32>
    %23 = vector.broadcast %22 : vector<8x1xf32> to vector<8x8xf32>
    %24 = arith.subf %20, %23 : vector<8x8xf32>
    %25 = math.exp %24 : vector<8x8xf32>
    %cst_9 = arith.constant dense<0.000000e+00> : vector<8xf32>
    %26 = vector.multi_reduction <add>, %25, %cst_9 [1] : vector<8x8xf32> to vector<8xf32>
    %27 = vector.shape_cast %26 : vector<8xf32> to vector<8x1xf32>
    %28 = tpu.reciprocal %27 {approx = true} : vector<8x1xf32> -> vector<8x1xf32>
    %29 = vector.broadcast %28 : vector<8x1xf32> to vector<8x8xf32>
    %30 = arith.mulf %25, %29 : vector<8x8xf32>
    %31 = arith.truncf %30 : vector<8x8xf32> to vector<8x8xbf16>
    %cst_10 = arith.constant dense<0.000000e+00> : vector<8x8xf32>
    %32 = tpu.matmul %31, %19, %cst_10 {dimension_numbers = #tpu.dot_dimension_numbers<[1], [0], [0], [1], [0, 0, 1, 1], [], []>} : vector<8x8xbf16>, vector<8x8xbf16>, vector<8x8xf32> -> vector<8x8xf32>
    %33 = vector.extract_strided_slice %12 {offsets = [0, 8], sizes = [8, 8], strides = [1, 1]} : vector<8x32xbf16> to vector<8x8xbf16>
    %34 = vector.extract_strided_slice %14 {offsets = [0, 8], sizes = [8, 8], strides = [1, 1]} : vector<8x32xbf16> to vector<8x8xbf16>
    %35 = vector.extract_strided_slice %16 {offsets = [0, 8], sizes = [8, 8], strides = [1, 1]} : vector<8x32xbf16> to vector<8x8xbf16>
    %cst_11 = arith.constant dense<0.000000e+00> : vector<8x8xf32>
    %36 = tpu.matmul %33, %34, %cst_11 {dimension_numbers = #tpu.dot_dimension_numbers<[1], [1], [0], [0], [0, 0, 1, 0], [], []>} : vector<8x8xbf16>, vector<8x8xbf16>, vector<8x8xf32> -> vector<8x8xf32>
    %cst_12 = arith.constant dense<0xFF800000> : vector<8xf32>
    %37 = vector.multi_reduction <maximumf>, %36, %cst_12 [1] : vector<8x8xf32> to vector<8xf32>
    %38 = vector.shape_cast %37 : vector<8xf32> to vector<8x1xf32>
    %39 = vector.broadcast %38 : vector<8x1xf32> to vector<8x8xf32>
    %40 = arith.subf %36, %39 : vector<8x8xf32>
    %41 = math.exp %40 : vector<8x8xf32>
    %cst_13 = arith.constant dense<0.000000e+00> : vector<8xf32>
    %42 = vector.multi_reduction <add>, %41, %cst_13 [1] : vector<8x8xf32> to vector<8xf32>
    %43 = vector.shape_cast %42 : vector<8xf32> to vector<8x1xf32>
    %44 = tpu.reciprocal %43 {approx = true} : vector<8x1xf32> -> vector<8x1xf32>
    %45 = vector.broadcast %44 : vector<8x1xf32> to vector<8x8xf32>
    %46 = arith.mulf %41, %45 : vector<8x8xf32>
    %47 = arith.truncf %46 : vector<8x8xf32> to vector<8x8xbf16>
    %cst_14 = arith.constant dense<0.000000e+00> : vector<8x8xf32>
    %48 = tpu.matmul %47, %35, %cst_14 {dimension_numbers = #tpu.dot_dimension_numbers<[1], [0], [0], [1], [0, 0, 1, 1], [], []>} : vector<8x8xbf16>, vector<8x8xbf16>, vector<8x8xf32> -> vector<8x8xf32>
    %49 = vector.extract_strided_slice %12 {offsets = [0, 16], sizes = [8, 8], strides = [1, 1]} : vector<8x32xbf16> to vector<8x8xbf16>
    %50 = vector.extract_strided_slice %14 {offsets = [0, 16], sizes = [8, 8], strides = [1, 1]} : vector<8x32xbf16> to vector<8x8xbf16>
    %51 = vector.extract_strided_slice %16 {offsets = [0, 16], sizes = [8, 8], strides = [1, 1]} : vector<8x32xbf16> to vector<8x8xbf16>
    %cst_15 = arith.constant dense<0.000000e+00> : vector<8x8xf32>
    %52 = tpu.matmul %49, %50, %cst_15 {dimension_numbers = #tpu.dot_dimension_numbers<[1], [1], [0], [0], [0, 0, 1, 0], [], []>} : vector<8x8xbf16>, vector<8x8xbf16>, vector<8x8xf32> -> vector<8x8xf32>
    %cst_16 = arith.constant dense<0xFF800000> : vector<8xf32>
    %53 = vector.multi_reduction <maximumf>, %52, %cst_16 [1] : vector<8x8xf32> to vector<8xf32>
    %54 = vector.shape_cast %53 : vector<8xf32> to vector<8x1xf32>
    %55 = vector.broadcast %54 : vector<8x1xf32> to vector<8x8xf32>
    %56 = arith.subf %52, %55 : vector<8x8xf32>
    %57 = math.exp %56 : vector<8x8xf32>
    %cst_17 = arith.constant dense<0.000000e+00> : vector<8xf32>
    %58 = vector.multi_reduction <add>, %57, %cst_17 [1] : vector<8x8xf32> to vector<8xf32>
    %59 = vector.shape_cast %58 : vector<8xf32> to vector<8x1xf32>
    %60 = tpu.reciprocal %59 {approx = true} : vector<8x1xf32> -> vector<8x1xf32>
    %61 = vector.broadcast %60 : vector<8x1xf32> to vector<8x8xf32>
    %62 = arith.mulf %57, %61 : vector<8x8xf32>
    %63 = arith.truncf %62 : vector<8x8xf32> to vector<8x8xbf16>
    %cst_18 = arith.constant dense<0.000000e+00> : vector<8x8xf32>
    %64 = tpu.matmul %63, %51, %cst_18 {dimension_numbers = #tpu.dot_dimension_numbers<[1], [0], [0], [1], [0, 0, 1, 1], [], []>} : vector<8x8xbf16>, vector<8x8xbf16>, vector<8x8xf32> -> vector<8x8xf32>
    %65 = vector.extract_strided_slice %12 {offsets = [0, 24], sizes = [8, 8], strides = [1, 1]} : vector<8x32xbf16> to vector<8x8xbf16>
    %66 = vector.extract_strided_slice %14 {offsets = [0, 24], sizes = [8, 8], strides = [1, 1]} : vector<8x32xbf16> to vector<8x8xbf16>
    %67 = vector.extract_strided_slice %16 {offsets = [0, 24], sizes = [8, 8], strides = [1, 1]} : vector<8x32xbf16> to vector<8x8xbf16>
    %cst_19 = arith.constant dense<0.000000e+00> : vector<8x8xf32>
    %68 = tpu.matmul %65, %66, %cst_19 {dimension_numbers = #tpu.dot_dimension_numbers<[1], [1], [0], [0], [0, 0, 1, 0], [], []>} : vector<8x8xbf16>, vector<8x8xbf16>, vector<8x8xf32> -> vector<8x8xf32>
    %cst_20 = arith.constant dense<0xFF800000> : vector<8xf32>
    %69 = vector.multi_reduction <maximumf>, %68, %cst_20 [1] : vector<8x8xf32> to vector<8xf32>
    %70 = vector.shape_cast %69 : vector<8xf32> to vector<8x1xf32>
    %71 = vector.broadcast %70 : vector<8x1xf32> to vector<8x8xf32>
    %72 = arith.subf %68, %71 : vector<8x8xf32>
    %73 = math.exp %72 : vector<8x8xf32>
    %cst_21 = arith.constant dense<0.000000e+00> : vector<8xf32>
    %74 = vector.multi_reduction <add>, %73, %cst_21 [1] : vector<8x8xf32> to vector<8xf32>
    %75 = vector.shape_cast %74 : vector<8xf32> to vector<8x1xf32>
    %76 = tpu.reciprocal %75 {approx = true} : vector<8x1xf32> -> vector<8x1xf32>
    %77 = vector.broadcast %76 : vector<8x1xf32> to vector<8x8xf32>
    %78 = arith.mulf %73, %77 : vector<8x8xf32>
    %79 = arith.truncf %78 : vector<8x8xf32> to vector<8x8xbf16>
    %cst_22 = arith.constant dense<0.000000e+00> : vector<8x8xf32>
    %80 = tpu.matmul %79, %67, %cst_22 {dimension_numbers = #tpu.dot_dimension_numbers<[1], [0], [0], [1], [0, 0, 1, 1], [], []>} : vector<8x8xbf16>, vector<8x8xbf16>, vector<8x8xf32> -> vector<8x8xf32>
    %81 = tpu.concatenate %32, %48, %64, %80 in 1 : vector<8x8xf32>, vector<8x8xf32>, vector<8x8xf32>, vector<8x8xf32> -> vector<8x32xf32>
    %c0_23 = arith.constant 0 : index
    %c0_24 = arith.constant 0 : index
    %c0_25 = arith.constant 0 : index
    %82 = vector.load %arg4[%c0_23, %c0_24, %c0_25] : memref<1x8x32xf32, #tpu.memory_space<vmem>>, vector<1x8x32xf32>
    %83 = vector.shape_cast %82 : vector<1x8x32xf32> to vector<8x32xf32>
    %84 = vector.shape_cast %81 : vector<8x32xf32> to vector<1x8x32xf32>
    tpu.vector_store %arg4[%c0_23, %c0_24, %c0_25], %84 {strides = array<i32>} : memref<1x8x32xf32, #tpu.memory_space<vmem>>, vector<1x8x32xf32>,
    return
  }
  func.func @transform_0(%arg0: i32) -> (i32, i32, i32) {
    %c0_i32 = arith.constant 0 : i32
    %c0_i32_0 = arith.constant 0 : i32
    %c0_i32_1 = arith.constant 0 : i32
    return %arg0, %c0_i32, %c0_i32_0 : i32, i32, i32
  }
  func.func @transform_1(%arg0: i32) -> (i32, i32) {
    %c0_i32 = arith.constant 0 : i32
    %c0_i32_0 = arith.constant 0 : i32
    %c0_i32_1 = arith.constant 0 : i32
    return %c0_i32, %c0_i32_0 : i32, i32
  }
  func.func @transform_2(%arg0: i32) -> (i32, i32) {
    %c0_i32 = arith.constant 0 : i32
    %c0_i32_0 = arith.constant 0 : i32
    %c0_i32_1 = arith.constant 0 : i32
    return %c0_i32, %c0_i32_0 : i32, i32
  }
  func.func @transform_3(%arg0: i32) -> (i32, i32, i32) {
    %c0_i32 = arith.constant 0 : i32
    %c0_i32_0 = arith.constant 0 : i32
    %c0_i32_1 = arith.constant 0 : i32
    return %arg0, %c0_i32, %c0_i32_0 : i32, i32, i32
  }
}

</mosaic_0001>

<bundles_post_ra>
// kernel: tpu_custom_call.1
= control target key start
LH: loop header
LB: loop body
LE: loop exit
PB: predicated region body
PF: predicated region fallthrough
CT: control target
= control target key end

     0   :  { %8 = vsyncpa [#allocation3], 0  ;;  %s1457_s0 = inlined_call_operand.hbm [shape: bf16[2,8,32], index: 0, kind: input, shape index: {}]   ;;  %s1458_s1 = inlined_call_operand.hbm [shape: bf16[32,96], index: 1, kind: input, shape index: {}]   ;;  %s1459_s2 = inlined_call_operand.vmem [shape: f32[1,96], index: 2, kind: input, shape index: {}]   ;;  %s1460_s3 = inlined_call_operand.hbm [shape: f32[2,8,32], index: 3, kind: output, shape index: {}]  }
   0x1   :  { %10 = vsyncpa [#allocation3 + $0x1], 0 }
   0x2   :  { %11 = vsyncpa [#allocation6], 0 }
   0x3   :  { %12 = vsyncpa [#allocation4], 0 }
   0x4   :  { %14 = vsyncpa [#allocation4 + $0x1], 0  ;;  %s1192_s12 = smov 0   ;;  %s1194_s13 = smov 0  }
   0x5   :  { %s1196_s14 = smov 0   ;;  %s1198_s15 = smov 0  }
   0x6 LB: > { %s1213_s16 = sadd.s32 4294967295, %s1149_s15   ;;  %s827_s17 = sadd.s32 4294967294, %s1149_s15   ;;  %s1149_s15 = sphi %s1198_s15, %s1480_s15   ;;  %s1145_s14 = sphi %s1196_s14, %s1479_s14   ;;  %s1141_s13 = sphi %s1194_s13, %s1478_s13   ;;  %s1137_s12 = sphi %s1192_s12, %s1477_s12  }
   0x7   : > { %p40_p0 = scmp.ne.s32.totalorder %s1141_s13, %s1137_s12  ;;  %p1461_p1 = scmp.eq.s32.totalorder %s1213_s16, 0 }
   0x8   : > { %p112_p3 = scmp.eq.s32.totalorder %s827_s17, 1  ;;  %p828_p5 = scmp.ge.s32.totalorder %s1149_s15, 1 }
   0x9   : > { %p1222_p4 = por %p1461_p1, %p40_p0  ;;  %p119_p7 = scmp.lt.s32.totalorder %s1149_s15, 3 }
   0xa   : > { %p1227_p6 = por %p112_p3, %p40_p0  ;;  %s1151_s21 = smov [#allocation5]  }
   0xb   : > { %s1464_s18 = scalar_select %p1222_p4, 1, 0 }
   0xc   : > { %s1465_s19 = scalar_select %p1227_p6, 1, 0 }
   0xd   : > { %p1232_p8 = pnand %p828_p5, %p119_p7  ;;  %s131_s22 = sshll.u32 %s1151_s21, 4  ;;  %s1236_s22 = int_to_ptr.vmem [resolvable:$true] %s131_s22 }
   0xe   : > { %s1248_s24 = sadd.s32 1, %s1149_s15   ;;  %s27_s25 = sadd.s32 1, %s1145_s14 }
   0xf   : > { %s1466_s20 = scalar_select %p1232_p8, 1, 0 }
  0x10   : > { %p936_p9 = pneg %p1232_p8  ;;  %s24_s26 = ssub.s32 %s1149_s15, %s1248_s24 }
  0x11   : > { %s1021_s29 = scalar_lea.hbm %s1458_s1, 256 }
  0x12   : > { %p1243_p11 = pnand %p936_p9, %p1461_p1  ;;  %p1022_p12 = scmp.ne.s32.totalorder %s1458_s1, %s1021_s29 }
  0x13   : > { %p1028_p5 = scmp.lt.u32.totalorder %s1021_s29, %s1458_s1 }
  0x14   : > { %p1023_p13 = pneg %p1243_p11 }
  0x16   : > { %p1024_p0 = pnand %p1023_p13, %p1022_p12 }
  0x18   : > { %p1025_p3 = pneg %p1024_p0 }
  0x1a   : > { %p1030_p7 = pnand %p1028_p5, %p1025_p3 }
  0x1c   : > { %1033 = shalt.err (!%p1030_p7)
}
  0x1d   : > { %s1034_s7 = scalar_lea.vmem %s1236_s22, 256  ;;  %p1042_p2 = scmp.lt.s32.totalorder %s1236_s22, %s1236_s22 }
  0x1e   : > { %p1035_p9 = scmp.ne.s32.totalorder %s1236_s22, %s1034_s7  ;;  %p1043_p6 = scmp.lt.s32.totalorder %s1034_s7, %s1034_s7 }
  0x20   : > { %p1037_p10 = pnand %p1035_p9, %p1023_p13  ;;  %p1044_p4 = por %p1043_p6, %p1042_p2 }
  0x22   : > { %p1038_p1 = pneg %p1037_p10 }
  0x24   : > { %p1045_p8 = pnand %p1044_p4, %p1038_p1 }
  0x26   : > { %1048 = shalt.err (!%p1045_p8)
}
  0x27   : > { %s1152_s8 = smov 64   ;;  %s1153_s9 = smov 4  }
  0x28   : > { %939 = dma.hbm_to_vmem [thread:$0]  (!%p1243_p11), %s1458_s1, 256, %s1236_s22, [#allocation6], %s1152_s8, %s1152_s8, %s1153_s9  }
  0x29   : > { %p25_p2 = scmp.eq.s32.totalorder %s24_s26, 0  ;;  %p34_p1 = scmp.ne.s32.totalorder %s1145_s14, %s1141_s13 }
  0x2a   : > { %p35_p4 = scmp.eq.s32.totalorder %s1149_s15, 0  ;;  %p949_p6 = scmp.lt.s32.totalorder %s1149_s15, 2 }
  0x2b   : > { %s1279_s17 = scalar_select %p25_p2, %s1145_s14, %s27_s25  }
  0x2c   : > { %p36_p8 = por %p35_p4, %p34_p1  ;;  %p1468_p10 = scmp.eq.s32.totalorder %s1213_s16, 1 }
  0x2d   : > { %s148_s27 = sand.u32 1, %s1145_s14   ;;  %s832_s28 = sshll.u32 %s1149_s15, 6 }
  0x2e   : > { %p1283_p12 = por %p1468_p10, %p34_p1  ;;  %s831_s29 = sshll.u32 %s148_s27, 2 }
  0x2f   : > { %s1292_s4 = scalar_lea.hbm %s1457_s0, %s832_s28  ;;  %s152_s22 = scalar_lea.vmem [#allocation2], %s831_s29 }
  0x30   : > { %s159_s25 = sshll.u32 %s152_s22, 4  ;;  %p1294_p11 = pnand %p949_p6, %p36_p8  ;;  %s1298_s25 = int_to_ptr.vmem [resolvable:$true] %s159_s25 }
  0x31   : > { %s149_s5 = scalar_lea.sflag [#allocation3], %s148_s27  ;;  %s1049_s6 = scalar_lea.hbm %s1292_s4, 64 }
  0x32   : > { %p1050_p13 = scmp.ne.s32.totalorder %s1292_s4, %s1049_s6  ;;  %p1051_p0 = pneg %p1294_p11 }
  0x33   : > { %s1054_s9 = scalar_lea.hbm %s1457_s0, 128  ;;  %p1055_p7 = scmp.lt.u32.totalorder %s1292_s4, %s1457_s0 }
  0x34   : > { %p1052_p3 = pnand %p1051_p0, %p1050_p13  ;;  %p1056_p9 = scmp.lt.u32.totalorder %s1054_s9, %s1049_s6 }
  0x35   : > { %p1058_p1 = scmp.lt.u32.totalorder %s1049_s6, %s1292_s4 }
  0x36   : > { %p1053_p5 = pneg %p1052_p3  ;;  %p1057_p2 = por %p1056_p9, %p1055_p7 }
  0x38   : > { %p1059_p4 = por %p1058_p1, %p1057_p2 }
  0x3a   : > { %p1060_p6 = pnand %p1059_p4, %p1053_p5 }
  0x3c   : > { %1063 = shalt.err (!%p1060_p6)
}
  0x3d   : > { %s1064_s27 = scalar_lea.vmem %s1298_s25, 64  ;;  %s1154_s28 = smov [#allocation2]  }
  0x3e   : > { %p1065_p8 = scmp.ne.s32.totalorder %s1298_s25, %s1064_s27  ;;  %s1069_s29 = sshll.u32 %s1154_s28, 4  ;;  %s1070_s29 = int_to_ptr.vmem [resolvable:$false] %s1069_s29 }
  0x3f   : > { %s1071_s23 = scalar_lea.vmem %s1070_s29, 128  ;;  %p1072_p3 = scmp.lt.s32.totalorder %s1298_s25, %s1070_s29 }
  0x40   : > { %p1067_p10 = pnand %p1065_p8, %p1051_p0  ;;  %p1073_p7 = scmp.lt.s32.totalorder %s1071_s23, %s1064_s27 }
  0x42   : > { %p1068_p13 = pneg %p1067_p10  ;;  %p1074_p9 = por %p1073_p7, %p1072_p3 }
  0x44   : > { %p1075_p2 = pnand %p1074_p9, %p1068_p13 }
  0x46   : > { %1078 = shalt.err (!%p1075_p2)
}
  0x47   : > { %943 = dma.hbm_to_vmem [thread:$0]  (!%p1294_p11), %s1292_s4, 64, %s1298_s25, %s149_s5  }
  0x48   : > { %p1471_p5 = scmp.ne.s32.totalorder %s1466_s20, 0 }
  0x49   : > { %s1328_s30 = sand.u32 (!%p1471_p5), 1, %s1141_s13   ;;  %p1472_p0 = scmp.ne.s32.totalorder (!%p1471_p5), %s1464_s18, 0 }
  0x4a   : > { %168 = sbr.rel (%p1471_p5) target bundleno = 1366 (0x556), region = 32  ;;  %s834_s22 = sshll.u32 (!%p1471_p5), %s1328_s30, 2 }
  0x4b   : > { %s171_s6 = scalar_lea.sflag (!%p1471_p5), [#allocation3], %s1328_s30  ;;  %s174_s7 = scalar_lea.vmem (!%p1471_p5), [#allocation2], %s834_s22 }
  0x51   : > { %1124 = dma.done.wait (%p1472_p0), %s171_s6, 64  }
  0x52   : > { %1126 = vsyncadd (%p1472_p0), %s171_s6, 4294967232  ;;  %p1473_p1 = scmp.eq.s32.totalorder %s1213_s16, 0 }
  0x54   : > { %1128 = dma.done.wait (%p1473_p1), [#allocation6], 256   ;;  %p1474_p11 = pmov %p1473_p1 }
  0x55   : > { %v1155_v0 = vmov 0.0   ;;  %vm1156_vm0 = vmmov 0   ;;  %v1003_v1 = vld [vmem:[#allocation5] sm:$0xff]   ;;  %v1004_v2 = vld [vmem:[#allocation5 + $0x8] sm:$0xff]   ;;  %v202_v3 = vld [vmem:[%s174_s7] sm:$0xf] }
  0x56   : > { %1130 = vsyncadd (%p1474_p11), [#allocation6], 4294967040  ;;  %872 = vmatprep.subr.bf16.mxu0 %v1155_v0  ;;  %876 = vmatprep.mubr.msk.bf16.mxu0 %vm1156_vm0, %v1155_v0  ;;  %vm226_vm1 = vcmask 261120   ;;  %v837_v4 = vld [vmem:[%s1459_s2] ss:$0 sm:$0xff]  ;;  %s1157_s4 = smov 96  }
  0x57   : > { %880 = vmatprep.subr.bf16.mxu1 %v1155_v0  ;;  %882 = vmatprep.mubr.msk.bf16.mxu1 %vm1156_vm0, %v1155_v0  ;;  %s1158_s25 = smov 120   ;;  %s1159_s26 = smov 88   ;;  %vm276_vm2 = vcmask 64512   ;;  %vm340_vm3 = vcmask 1043456   ;;  %vm728_vm4 = vcmask 130048   ;;  %vm730_vm5 = vcmask 195584  }
  0x58   : > { %873 = vmatpush3.bf16.msra.mxu0 %v1003_v1  ;;  %s1160_s5 = smov 80   ;;  %s1161_s8 = smov 112  }
  0x59   : > { %874 = vmatprep.subr.bf16.mxu0 %v1155_v0  ;;  %s1162_s9 = smov 72   ;;  %s1163_s10 = smov 104  }
  0x5a   : > { %s1164_s11 = smov 56   ;;  %s1165_s27 = smov 64  }
  0x5b   : > { %s1166_s28 = smov 40   ;;  %s1167_s29 = smov 48  }
  0x5c   : > { %875 = vmatpush3.bf16.msra.mxu0 %v1004_v2  ;;  %s1168_s23 = smov 8   ;;  %s1169_s22 = smov 16  }
  0x5d   : > { %886 = vmatprep.subr.bf16.mxu0 %v1155_v0  ;;  %s1170_s6 = smov 24   ;;  %s836_s7 = sshll.u32 %s1328_s30, 3 }
  0x5e   : > { %s850_s18 = sshll.u32 %s1213_s16, 7  ;;  %s200_s20 = scalar_lea.vmem [#allocation7], %s836_s7 }
  0x5f   : > { %877 = vmatmul.mubr.msk.bf16.vlgmr.msra.gmra.mrb[0].mxu0 %vm226_vm1, %v202_v3  ;;  %s734_s16 = scalar_lea.sflag [#allocation4], %s1328_s30 }
  0x60   : > { %888 = vmatprep.mubr.msk.bf16.mxu0 %vm1156_vm0, %v1155_v0 }
 0x132   : > { %v264_v5 = vpop.f32.mrb[0].mxu0 }
 0x133   : > { %v265_v6 = vadd.f32 %v837_v4, %v264_v5  ;;  %v878_v7 = vpop.f32.mrb[1].mxu0 }
 0x134   : > { %v267_v8 = vpop.f32.mrb[2].mxu0 }
 0x135   : > { %v270_v9 = vmul.f32 0.35355338, %v265_v6  ;;  %v1354_v10 = vpack.c.bf16 %v265_v6, %v265_v6  ;;  %v879_v11 = vpop.f32.mrb[3].mxu0 }
 0x137   : > { %v271_v12 = vpack.c.bf16 %v270_v9, %v270_v9  ;;  %274 = vrot.lane.b32.xlu0 %v1354_v10, %s1157_s4  ;;  %s747_s4 = sshll.u32 %s200_s20, 4  ;;  %s1414_s4 = int_to_ptr.vmem [resolvable:$true] %s747_s4 }
 0x139   : > { %385 = vrot.lane.b32.xlu1 %v271_v12, %s1158_s25 }
 0x13b   : > { %387 = vrot.lane.b32.xlu0 %v1354_v10, %s1159_s26 }
 0x13d   : > { %497 = vrot.lane.b32.xlu1 %v1354_v10, %s1160_s5  ;;  %s1412_s5 = scalar_lea.hbm %s1460_s3, %s850_s18 }
 0x13f   : > { %495 = vrot.lane.b32.xlu0 %v271_v12, %s1161_s8  ;;  %s1079_s8 = scalar_lea.vmem %s1414_s4, 128 }
 0x140   : > { %p1080_p4 = scmp.ne.s32.totalorder %s1414_s4, %s1079_s8 }
 0x141   : > { %607 = vrot.lane.b32.xlu1 %v1354_v10, %s1162_s9  ;;  %s1171_s9 = smov [#allocation7]  }
 0x142   : > { %p1081_p6 = pnand %p1080_p4, %p1283_p12 }
 0x143   : > { %605 = vrot.lane.b32.xlu0 %v271_v12, %s1163_s10  ;;  %s1083_s10 = sshll.u32 %s1171_s9, 4  ;;  %s1084_s10 = int_to_ptr.vmem [resolvable:$false] %s1083_s10 }
 0x144   : > { %p1082_p8 = pneg %p1081_p6  ;;  %p1086_p10 = scmp.lt.s32.totalorder %s1414_s4, %s1084_s10 }
 0x1a9   : > { %v275_v13 = vpop.permute.xlu0 %274 }
 0x1aa   : > { %v281_v14 = vsel %vm276_vm2, %v275_v13, 0 }
 0x1ab   : > { %881 = vmatpush3.bf16.xpose.msra.mxu1 %v281_v14  ;;  %v386_v16 = vpop.permute.xlu1 %385 }
 0x1ac   : > { %892 = vmatprep.subr.bf16.mxu1 %v1155_v0 }
 0x1ad   : > { %v388_v15 = vpop.permute.xlu0 %387 }
 0x1ae   : > { %v393_v17 = vsel %vm276_vm2, %v388_v15, 0 }
 0x1af   : > { %v498_v18 = vpop.permute.xlu1 %497 }
 0x1b0   : > { %v503_v19 = vsel %vm276_vm2, %v498_v18, 0 }
 0x1b1   : > { %v496_v21 = vpop.permute.xlu0 %495 }
 0x1b2   : > { %883 = vmatmul.mubr.msk.bf16.vlgmr.msra.gmra.mrb[0].mxu1 %vm276_vm2, %v271_v12 }
 0x1b3   : > { %893 = vmatpush3.bf16.xpose.msra.mxu1 %v393_v17  ;;  %894 = vmatprep.mubr.msk.bf16.mxu1 %vm1156_vm0, %v1155_v0  ;;  %v608_v20 = vpop.permute.xlu1 %607 }
 0x1b4   : > { %904 = vmatprep.subr.bf16.mxu1 %v1155_v0  ;;  %v613_v22 = vsel %vm276_vm2, %v608_v20, 0 }
 0x1b5   : > { %v606_v23 = vpop.permute.xlu0 %605 }
 0x1ba   : > { %895 = vmatmul.mubr.msk.bf16.vlgmr.msra.gmra.mrb[4].mxu1 %vm276_vm2, %v386_v16 }
 0x1bb   : > { %905 = vmatpush3.bf16.xpose.msra.mxu1 %v503_v19  ;;  %906 = vmatprep.mubr.msk.bf16.mxu1 %vm1156_vm0, %v1155_v0 }
 0x1bc   : > { %916 = vmatprep.subr.bf16.mxu1 %v1155_v0 }
 0x1c2   : > { %907 = vmatmul.mubr.msk.bf16.vlgmr.msra.gmra.mrb[8].mxu1 %vm276_vm2, %v496_v21 }
 0x1c3   : > { %917 = vmatpush3.bf16.xpose.msra.mxu1 %v613_v22  ;;  %918 = vmatprep.mubr.msk.bf16.mxu1 %vm1156_vm0, %v1155_v0 }
 0x1ca   : > { %919 = vmatmul.mubr.msk.bf16.vlgmr.msra.gmra.mrb[12].mxu1 %vm276_vm2, %v606_v23 }
 0x285   : > { %v317_v24 = vpop.f32.mrb[0].mxu1 }
 0x286   : > { %v884_v25 = vpop.f32.mrb[1].mxu1  ;;  %v323_v26 = vsel %vm276_vm2, %v317_v24, -inf }
 0x287   : > { %324 = vmax.xlane.f32.xlu1 %v323_v26  ;;  %v320_v27 = vpop.f32.mrb[2].mxu1 }
 0x288   : > { %v885_v28 = vpop.f32.mrb[3].mxu1 }
 0x28d   : > { %v429_v29 = vpop.f32.mrb[4].mxu1 }
 0x28e   : > { %v896_v30 = vpop.f32.mrb[5].mxu1  ;;  %v435_v31 = vsel %vm276_vm2, %v429_v29, -inf }
 0x28f   : > { %436 = vmax.xlane.f32.xlu0 %v435_v31  ;;  %v432_v32 = vpop.f32.mrb[6].mxu1 }
 0x290   : > { %v897_v33 = vpop.f32.mrb[7].mxu1 }
 0x295   : > { %v539_v34 = vpop.f32.mrb[8].mxu1 }
 0x296   : > { %v908_v35 = vpop.f32.mrb[9].mxu1  ;;  %v545_v36 = vsel %vm276_vm2, %v539_v34, -inf }
 0x297   : > { %546 = vmax.xlane.f32.xlu0 %v545_v36  ;;  %v542_v37 = vpop.f32.mrb[10].mxu1 }
 0x298   : > { %v909_v38 = vpop.f32.mrb[11].mxu1 }
 0x29d   : > { %v649_v39 = vpop.f32.mrb[12].mxu1 }
 0x29e   : > { %v920_v40 = vpop.f32.mrb[13].mxu1  ;;  %v655_v41 = vsel %vm276_vm2, %v649_v39, -inf }
 0x29f   : > { %656 = vmax.xlane.f32.xlu1 %v655_v41  ;;  %v652_v42 = vpop.f32.mrb[14].mxu1 }
 0x2a0   : > { %v921_v43 = vpop.f32.mrb[15].mxu1 }
 0x314   : > { %v325_v44 = vpop.xlane.xlu1 %324 }
 0x315   : > { %v326_v45 = vsub.f32 %v317_v24, %v325_v44 }
 0x317   : > { %v327_v46 = vmul.f32 1.442695, %v326_v45 }
 0x319   : > { %1005 = vpow2.f32 %v327_v46 }
 0x31c   : > { %v437_v47 = vpop.xlane.xlu0 %436 }
 0x31d   : > { %v438_v48 = vsub.f32 %v429_v29, %v437_v47 }
 0x31f   : > { %v439_v49 = vmul.f32 1.442695, %v438_v48 }
 0x321   : > { %1007 = vpow2.f32 %v439_v49 }
 0x323   : > { %v1006_v50 = vpop.eup %1005 }
 0x324   : > { %v547_v51 = vpop.xlane.xlu0 %546  ;;  %v329_v52 = vsel %vm276_vm2, %v1006_v50, 0.0 }
 0x325   : > { %v548_v53 = vsub.f32 %v539_v34, %v547_v51  ;;  %330 = vadd.xlane.f32.xlu0 %v329_v52 }
 0x327   : > { %v549_v54 = vmul.f32 1.442695, %v548_v53 }
 0x329   : > { %1009 = vpow2.f32 %v549_v54 }
 0x32b   : > { %v1008_v55 = vpop.eup %1007 }
 0x32c   : > { %v441_v56 = vsel %vm276_vm2, %v1008_v55, 0.0  ;;  %v657_v59 = vpop.xlane.xlu1 %656 }
 0x32d   : > { %442 = vadd.xlane.f32.xlu1 %v441_v56  ;;  %v658_v60 = vsub.f32 %v649_v39, %v657_v59 }
 0x32f   : > { %v659_v61 = vmul.f32 1.442695, %v658_v60 }
 0x331   : > { %1011 = vpow2.f32 %v659_v61 }
 0x333   : > { %v1010_v57 = vpop.eup %1009 }
 0x334   : > { %v551_v58 = vsel %vm276_vm2, %v1010_v57, 0.0 }
 0x335   : > { %552 = vadd.xlane.f32.xlu0 %v551_v58 }
 0x33b   : > { %v1012_v62 = vpop.eup %1011 }
 0x33c   : > { %v661_v63 = vsel %vm276_vm2, %v1012_v62, 0.0 }
 0x33e   : > { %447 = vrot.lane.b32.xlu1 %v1354_v10, %s1164_s11  ;;  %s1085_s11 = scalar_lea.vmem %s1084_s10, 256 }
 0x33f   : > { %p1087_p13 = scmp.lt.s32.totalorder %s1085_s11, %s1079_s8 }
 0x341   : > { %p1088_p3 = por %p1087_p13, %p1086_p10 }
 0x343   : > { %p1089_p7 = pnand %p1088_p3, %p1082_p8 }
 0x34b   : > { %335 = vrot.lane.b32.xlu0 %v1354_v10, %s1165_s27 }
 0x34f   : > { %667 = vrot.lane.b32.xlu0 %v1354_v10, %s1166_s28 }
 0x362   : > { %662 = vadd.xlane.f32.xlu1 %v661_v63 }
 0x373   : > { %557 = vrot.lane.b32.xlu1 %v1354_v10, %s1167_s29 }
 0x3b2   : > { %v331_v1 = vpop.xlane.xlu0 %330 }
 0x3b3   : > { %1013 = vrcp.f32 %v331_v1 }
 0x3ba   : > { %v443_v2 = vpop.xlane.xlu1 %442 }
 0x3bb   : > { %1015 = vrcp.f32 %v443_v2 }
 0x3bd   : > { %v1014_v3 = vpop.eup %1013 }
 0x3be   : > { %v333_v5 = vmul.f32 %v1014_v3, %v1006_v50  ;;  %v448_v8 = vpop.permute.xlu1 %447 }
 0x3bf   : > { %v453_v12 = vsel %vm340_vm3, %v448_v8, 0 }
 0x3c0   : > { %v334_v9 = vpack.c.bf16 %v333_v5, %v333_v5 }
 0x3c2   : > { %v553_v4 = vpop.xlane.xlu0 %552 }
 0x3c3   : > { %1017 = vrcp.f32 %v553_v4 }
 0x3c5   : > { %v1016_v11 = vpop.eup %1015 }
 0x3c6   : > { %v336_v6 = vpop.permute.xlu0 %335  ;;  %v445_v10 = vmul.f32 %v1016_v11, %v1008_v55 }
 0x3c7   : > { %v342_v7 = vsel %vm340_vm3, %v336_v6, 0 }
 0x3c8   : > { %887 = vmatpush3.bf16.msra.mxu0 %v342_v7  ;;  %v446_v13 = vpack.c.bf16 %v445_v10, %v445_v10 }
 0x3c9   : > { %898 = vmatprep.subr.bf16.mxu0 %v1155_v0 }
 0x3ca   : > { %v668_v19 = vpop.permute.xlu0 %667 }
 0x3cb   : > { %889 = vmatmul.mubr.msk.bf16.vlgmr.msra.gmra.mrb[4].mxu0 %vm276_vm2, %v334_v9  ;;  %v673_v21 = vsel %vm340_vm3, %v668_v19, 0 }
 0x3cc   : > { %899 = vmatpush3.bf16.msra.mxu0 %v453_v12  ;;  %900 = vmatprep.mubr.msk.bf16.mxu0 %vm1156_vm0, %v1155_v0 }
 0x3cd   : > { %910 = vmatprep.subr.bf16.mxu0 %v1155_v0  ;;  %v1018_v14 = vpop.eup %1017 }
 0x3ce   : > { %v555_v16 = vmul.f32 %v1018_v14, %v1010_v57 }
 0x3d0   : > { %v556_v20 = vpack.c.bf16 %v555_v16, %v555_v16 }
 0x3d3   : > { %901 = vmatmul.mubr.msk.bf16.vlgmr.msra.gmra.mrb[8].mxu0 %vm276_vm2, %v446_v13 }
 0x3d4   : > { %912 = vmatprep.mubr.msk.bf16.mxu0 %vm1156_vm0, %v1155_v0 }
 0x3ef   : > { %v663_v15 = vpop.xlane.xlu1 %662 }
 0x3f0   : > { %1019 = vrcp.f32 %v663_v15 }
 0x3f3   : > { %v558_v17 = vpop.permute.xlu1 %557 }
 0x3f4   : > { %v563_v18 = vsel %vm340_vm3, %v558_v17, 0 }
 0x3f5   : > { %911 = vmatpush3.bf16.msra.mxu0 %v563_v18 }
 0x3f6   : > { %922 = vmatprep.subr.bf16.mxu0 %v1155_v0 }
 0x3f8   : > { %913 = vmatmul.mubr.msk.bf16.vlgmr.msra.gmra.mrb[12].mxu0 %vm276_vm2, %v556_v20 }
 0x3f9   : > { %923 = vmatpush3.bf16.msra.mxu0 %v673_v21  ;;  %924 = vmatprep.mubr.msk.bf16.mxu0 %vm1156_vm0, %v1155_v0 }
 0x3fa   : > { %v1020_v22 = vpop.eup %1019 }
 0x3fb   : > { %v665_v23 = vmul.f32 %v1020_v22, %v1012_v62 }
 0x3fd   : > { %v666_v24 = vpack.c.bf16 %v665_v23, %v665_v23 }
 0x400   : > { %925 = vmatmul.mubr.msk.bf16.vlgmr.msra.gmra.mrb[16].mxu0 %vm276_vm2, %v666_v24 }
 0x49e   : > { %v378_v25 = vpop.f32.mrb[4].mxu0 }
 0x49f   : > { %v890_v26 = vpop.f32.mrb[5].mxu0 }
 0x4a0   : > { %v381_v27 = vpop.f32.mrb[6].mxu0 }
 0x4a1   : > { %v891_v28 = vpop.f32.mrb[7].mxu0 }
 0x4a6   : > { %v489_v29 = vpop.f32.mrb[8].mxu0 }
 0x4a7   : > { %716 = vrot.lane.b32.xlu1 %v489_v29, %s1168_s23  ;;  %v902_v30 = vpop.f32.mrb[9].mxu0 }
 0x4a8   : > { %v492_v31 = vpop.f32.mrb[10].mxu0 }
 0x4a9   : > { %v903_v32 = vpop.f32.mrb[11].mxu0 }
 0x4cb   : > { %v599_v33 = vpop.f32.mrb[12].mxu0 }
 0x4cc   : > { %720 = vrot.lane.b32.xlu0 %v599_v33, %s1169_s22  ;;  %v914_v0 = vpop.f32.mrb[13].mxu0 }
 0x4cd   : > { %v602_v34 = vpop.f32.mrb[14].mxu0 }
 0x4ce   : > { %v915_v35 = vpop.f32.mrb[15].mxu0 }
 0x4d3   : > { %v709_v36 = vpop.f32.mrb[16].mxu0 }
 0x4d4   : > { %724 = vrot.lane.b32.xlu1 %v709_v36, %s1170_s6  ;;  %v926_v37 = vpop.f32.mrb[17].mxu0 }
 0x4d5   : > { %v712_v38 = vpop.f32.mrb[18].mxu0 }
 0x4d6   : > { %v927_v39 = vpop.f32.mrb[19].mxu0 }
 0x519   : > { %v717_v40 = vpop.permute.xlu1 %716 }
 0x51a   : > { %v727_v42 = vsel %vm276_vm2, %v378_v25, %v717_v40 }
 0x53e   : > { %v721_v41 = vpop.permute.xlu0 %720 }
 0x53f   : > { %v729_v43 = vsel %vm728_vm4, %v727_v42, %v721_v41 }
 0x546   : > { %v725_v44 = vpop.permute.xlu1 %724 }
 0x547   : > { %v731_v45 = vsel %vm730_vm5, %v729_v43, %v725_v44 }
 0x548   : > { %732 = vst.msk [vmem:[%s200_s20] sm:$0xff] %vm226_vm1, %v731_v45 }
 0x549   : > { %1092 = shalt.err (!%p1089_p7)
}
 0x54a   : > { %s1093_s30 = scalar_lea.hbm %s1412_s5, 128  ;;  %s1097_s29 = scalar_lea.hbm %s1460_s3, 256 }
 0x54b   : > { %p1094_p9 = scmp.ne.s32.totalorder %s1412_s5, %s1093_s30  ;;  %p1098_p0 = scmp.lt.u32.totalorder %s1412_s5, %s1460_s3 }
 0x54c   : > { %p1099_p1 = scmp.lt.u32.totalorder %s1097_s29, %s1093_s30  ;;  %p1101_p4 = scmp.lt.u32.totalorder %s1093_s30, %s1412_s5 }
 0x54d   : > { %p1095_p2 = pnand %p1094_p9, %p1283_p12 }
 0x54e   : > { %p1100_p11 = por %p1099_p1, %p1098_p0 }
 0x54f   : > { %p1096_p5 = pneg %p1095_p2 }
 0x550   : > { %p1102_p6 = por %p1101_p4, %p1100_p11 }
 0x552   : > { %p1103_p8 = pnand %p1102_p6, %p1096_p5 }
 0x554   : > { %1106 = shalt.err (!%p1103_p8)
}
 0x555   : > { %934 = dma.vmem_to_hbm [thread:$0]  (%p1283_p12), %s1414_s4, 128, %s1412_s5, %s734_s16  }
 0x556 PF: > { %s759_s6 = sand.u32 1, %s1137_s12   ;;  %p1475_p10 = scmp.ne.s32.totalorder %s1465_s19, 0 }
 0x557   : > { %p1476_p13 = scmp.ge.s32.totalorder %s1149_s15, 2  ;;  %s760_s7 = scalar_lea.sflag [#allocation4], %s759_s6 }
 0x559   : > { %p945_p3 = pnand %p1476_p13, %p1475_p10 }
 0x55b   : > { %1132 = dma.done.wait (!%p945_p3), %s760_s7, 128  }
 0x55c   : > { %1134 = vsyncadd (!%p945_p3), %s760_s7, 4294967168  ;;  %p17_p7 = scmp.ge.s32.totalorder %s1248_s24, 4   ;;  %s1477_s12 = smov %s1141_s13 }
 0x55d   : > { %s1478_s13 = smov %s1145_s14  ;;  %s1479_s14 = smov %s1279_s17 }
 0x55e   : > { %s1480_s15 = smov %s1248_s24  ;;  %19 = sbr.rel (!%p17_p7) target bundleno = 6 (0x6), region = 81 }
 0x565   :  { %765 = vsyncpa [#allocation3], 1 }
 0x566   :  { %767 = vsyncpa [#allocation3 + $0x1], 1 }
 0x567   :  { %768 = vsyncpa [#allocation6], 1 }
 0x568   :  { %769 = vsyncpa [#allocation4], 1 }
 0x569   :  { %771 = vsyncpa [#allocation4 + $0x1], 1 }

</bundles_post_ra>
